<compile_context>
chip_gen: v7x
topology: tpu7x:2x2x1
jax: 0.10.0
libtpu: 0.0.40
codegen_flags: <defaults>
</compile_context>

<pallas_src>
import functools

import jax
import jax.numpy as jnp
from jax.experimental import pallas as pl
from jax.experimental.pallas import tpu as pltpu


def _round_up(x, m):
    return (x + m - 1) // m * m


def _pick_tile_b(B, cap=2048):
    """Batch tile heuristic.

    - B <= 512: one exact block equal to the full batch dim (grid=(1,)).
    - B  > 512: >=2 grid steps (v7x megacore sharding) with tiles as large as
      VMEM comfortably allows (<= cap rows); tile is a multiple of 16 so bf16
      sublane packing stays clean and the (8,128) block constraint holds.
    """
    if B <= 512:
        return B
    return min(cap, _round_up(pl.cdiv(B, 2), 16))


def _mlp_kernel(x_ref, w1_ref, b1_ref, w2_ref, b2_ref, o_ref):
    # x_ref:  (TB, emb_dim)       f32 (cast to compute dtype in-kernel)
    # w1_ref: (emb_dim, hidden)   compute dtype (bf16 default)
    # b1_ref: (1, hidden)         f32
    # w2_ref: (hidden, tags_p)    compute dtype
    # b2_ref: (1, tags_p)         f32
    # o_ref:  (TB, tags_p)        compute dtype (lane-dense writeback)
    x = x_ref[...].astype(w1_ref.dtype)            # in-kernel cast, hidden under MXU
    h = jnp.dot(x, w1_ref[...], preferred_element_type=jnp.float32)
    h = jnp.maximum(h + b1_ref[...], 0.0)          # bias + ReLU in f32 (v5e-safe)
    # Dropout is identity in eval mode.
    h = h.astype(w2_ref.dtype)                     # feed second MXU pass at native rate
    out = jnp.dot(h, w2_ref[...], preferred_element_type=jnp.float32)
    o_ref[...] = (out + b2_ref[...]).astype(o_ref.dtype)


def prepare_params(w1, b1, w2, b2, *, compute_dtype=jnp.bfloat16):
    """One-time weight prep (cast + lane-dense pad). Do this OUTSIDE the hot
    path and reuse the result across forward calls.

    Weights are stored pre-transposed as [in_features, out_features].
    Returns (w1_c, b1_c, w2_c, b2_c, tags).  Use compute_dtype=jnp.float32
    for strict f32 parity with the PyTorch module.
    """
    tags = w2.shape[1]
    tags_p = _round_up(max(tags, 128), 128)        # lane-dense output columns
    w1_c = w1.astype(compute_dtype)
    b1_c = b1.reshape(1, -1).astype(jnp.float32)
    w2_p = jnp.pad(w2, ((0, 0), (0, tags_p - tags))) if tags_p != tags else w2
    b2_p = (jnp.pad(b2.reshape(1, -1), ((0, 0), (0, tags_p - tags)))
            if tags_p != tags else b2.reshape(1, -1))
    w2_c = w2_p.astype(compute_dtype)
    b2_c = b2_p.astype(jnp.float32)
    return w1_c, b1_c, w2_c, b2_c, tags


@functools.partial(jax.jit, static_argnames=("tags", "tile_b"))
def classify_city_forward(x, w1_c, b1_c, w2_c, b2_c, *, tags, tile_b=None):
    """x: [B, emb_dim] f32; prepared params from prepare_params().
    Returns logits [B, tags] f32."""
    B, emb_dim = x.shape
    hidden = w1_c.shape[1]
    tags_p = w2_c.shape[1]
    compute_dtype = w1_c.dtype

    if tile_b is None:
        tile_b = _pick_tile_b(B)
    grid = (pl.cdiv(B, tile_b),)   # ragged last tile handled by Pallas masking

    cw = jnp.dtype(compute_dtype).itemsize
    cost = pl.CostEstimate(
        flops=2 * B * (emb_dim * hidden + hidden * tags_p),
        transcendentals=0,
        bytes_accessed=(B * emb_dim * 4                # x read (f32)
                        + emb_dim * hidden * cw        # W1
                        + hidden * tags_p * cw         # W2
                        + hidden * 4 + tags_p * 4      # biases (f32)
                        + B * tags_p * cw),            # output writeback
    )

    out_p = pl.pallas_call(
        _mlp_kernel,
        out_shape=jax.ShapeDtypeStruct((B, tags_p), compute_dtype),
        grid_spec=pltpu.PrefetchScalarGridSpec(
            num_scalar_prefetch=0,
            grid=grid,
            in_specs=[
                pl.BlockSpec((tile_b, emb_dim), lambda i: (i, 0)),   # x tile (f32)
                pl.BlockSpec((emb_dim, hidden), lambda i: (0, 0)),   # W1 (resident)
                pl.BlockSpec((1, hidden), lambda i: (0, 0)),         # b1
                pl.BlockSpec((hidden, tags_p), lambda i: (0, 0)),    # W2 (resident)
                pl.BlockSpec((1, tags_p), lambda i: (0, 0)),         # b2
            ],
            out_specs=pl.BlockSpec((tile_b, tags_p), lambda i: (i, 0)),
        ),
        compiler_params=pltpu.CompilerParams(
            dimension_semantics=("parallel",),
        ),
        cost_estimate=cost,
    )(x, w1_c, b1_c, w2_c, b2_c)

    # Strip lane padding; tiny slice, cast logits back to f32 for parity.
    return out_p[:, :tags].astype(jnp.float32)


def init_params(key, emb_dim, hidden, tags):
    """Deterministic synthetic params (PyTorch nn.Linear-like uniform init)."""
    k1, k2, k3, k4 = jax.random.split(key, 4)
    bound1 = 1.0 / jnp.sqrt(emb_dim)
    bound2 = 1.0 / jnp.sqrt(hidden)
    # Stored pre-transposed: [in_features, out_features]
    w1 = jax.random.uniform(k1, (emb_dim, hidden), jnp.float32, -bound1, bound1)
    b1 = jax.random.uniform(k2, (1, hidden), jnp.float32, -bound1, bound1)
    w2 = jax.random.uniform(k3, (hidden, tags), jnp.float32, -bound2, bound2)
    b2 = jax.random.uniform(k4, (1, tags), jnp.float32, -bound2, bound2)
    return w1, b1, w2, b2


if __name__ == "__main__":
    # Shapes consistent with the module: emb_dim=128, hidden=512 (fixed by the
    # module), tags (n_classes_city)=16.
    EMB, HID, TAGS = 128, 512, 16

    key = jax.random.PRNGKey(0)
    kx, kp, kx2 = jax.random.split(key, 3)
    w1, b1, w2, b2 = init_params(kp, EMB, HID, TAGS)

    # One-time weight prep (cast to bf16, pad tags to a lane-dense 128).
    w1_c, b1_c, w2_c, b2_c, tags = prepare_params(w1, b1, w2, b2)

    def ref_fwd(x):
        return jnp.maximum(x @ w1 + b1, 0.0) @ w2 + b2

    # Case 1: tiny batch -> single exact block (tile_b == B), grid=(1,).
    B1 = 8
    x1 = jax.random.normal(kx, (B1, EMB), jnp.float32)
    out1 = jax.block_until_ready(
        classify_city_forward(x1, w1_c, b1_c, w2_c, b2_c, tags=tags))
    assert out1.shape == (B1, TAGS)
    # bf16 operands/writeback + f32 accumulation -> loosened tolerance.
    assert jnp.allclose(out1, ref_fwd(x1), atol=5e-2, rtol=5e-2), \
        "mismatch vs reference (B=8, single block)"

    # Case 2: batch not a multiple of 8, default tile -> block equals the
    # full batch dim (no padding, no masking).
    B2 = 20
    x2 = jax.random.normal(kx2, (B2, EMB), jnp.float32)
    out2 = jax.block_until_ready(
        classify_city_forward(x2, w1_c, b1_c, w2_c, b2_c, tags=tags))
    assert out2.shape == (B2, TAGS)
    assert jnp.allclose(out2, ref_fwd(x2), atol=5e-2, rtol=5e-2), \
        "mismatch vs reference (B=20, full-batch block)"

    # Case 3: explicit tile smaller than B -> multi-step grid with a ragged
    # (masked) last tile; exercises the no-pad cdiv path.
    out3 = jax.block_until_ready(
        classify_city_forward(x2, w1_c, b1_c, w2_c, b2_c, tags=tags, tile_b=16))
    assert out3.shape == (B2, TAGS)
    assert jnp.allclose(out3, ref_fwd(x2), atol=5e-2, rtol=5e-2), \
        "mismatch vs reference (B=20, tile_b=16 ragged tile)"

    print("KERNEL_OK")
</pallas_src>

<mosaic_0001>
module attributes {stable_mosaic.version = 11 : i64} {
  func.func @_mlp_kernel(%arg0: i32, %arg1: memref<8x128xf32, #tpu.memory_space<vmem>>, %arg2: memref<128x512xbf16, #tpu.memory_space<vmem>>, %arg3: memref<1x512xf32, #tpu.memory_space<vmem>>, %arg4: memref<512x128xbf16, #tpu.memory_space<vmem>>, %arg5: memref<1x128xf32, #tpu.memory_space<vmem>>, %arg6: memref<8x128xbf16, #tpu.memory_space<vmem>>) attributes {dimension_semantics = [#tpu.dimension_semantics<parallel>], iteration_bounds = array<i64: 1>, scalar_prefetch = 0 : i64, scratch_operands = 0 : i64, tpu.core_type = #tpu.core_type<tc>, window_params = [{transform_indices = @transform_0, window_bounds = array<i64: 8, 128>}, {pipeline_mode = #tpu.pipeline_mode<synchronous>, transform_indices = @transform_1, window_bounds = array<i64: 128, 512>}, {pipeline_mode = #tpu.pipeline_mode<synchronous>, transform_indices = @transform_2, window_bounds = array<i64: 1, 512>}, {pipeline_mode = #tpu.pipeline_mode<synchronous>, transform_indices = @transform_3, window_bounds = array<i64: 512, 128>}, {pipeline_mode = #tpu.pipeline_mode<synchronous>, transform_indices = @transform_4, window_bounds = array<i64: 1, 128>}, {transform_indices = @transform_5, window_bounds = array<i64: 8, 128>}]} {
    %c0 = arith.constant 0 : index
    %c0_0 = arith.constant 0 : index
    %0 = vector.load %arg1[%c0, %c0_0] : memref<8x128xf32, #tpu.memory_space<vmem>>, vector<8x128xf32>
    %1 = arith.truncf %0 : vector<8x128xf32> to vector<8x128xbf16>
    %c0_1 = arith.constant 0 : index
    %c0_2 = arith.constant 0 : index
    %2 = vector.load %arg2[%c0_1, %c0_2] : memref<128x512xbf16, #tpu.memory_space<vmem>>, vector<128x512xbf16>
    %cst = arith.constant dense<0.000000e+00> : vector<8x512xf32>
    %3 = tpu.matmul %1, %2, %cst {dimension_numbers = #tpu.dot_dimension_numbers<[1], [0], [0], [1], [0, 0, 1, 1], [], []>} : vector<8x128xbf16>, vector<128x512xbf16>, vector<8x512xf32> -> vector<8x512xf32>
    %c0_3 = arith.constant 0 : index
    %c0_4 = arith.constant 0 : index
    %4 = vector.load %arg3[%c0_3, %c0_4] : memref<1x512xf32, #tpu.memory_space<vmem>>, vector<1x512xf32>
    %5 = vector.broadcast %4 : vector<1x512xf32> to vector<8x512xf32>
    %6 = arith.addf %3, %5 : vector<8x512xf32>
    %cst_5 = arith.constant 0.000000e+00 : f32
    %7 = vector.broadcast %cst_5 : f32 to vector<8x512xf32>
    %8 = arith.maximumf %6, %7 : vector<8x512xf32>
    %9 = arith.truncf %8 : vector<8x512xf32> to vector<8x512xbf16>
    %c0_6 = arith.constant 0 : index
    %c0_7 = arith.constant 0 : index
    %10 = vector.load %arg4[%c0_6, %c0_7] : memref<512x128xbf16, #tpu.memory_space<vmem>>, vector<512x128xbf16>
    %cst_8 = arith.constant dense<0.000000e+00> : vector<8x128xf32>
    %11 = tpu.matmul %9, %10, %cst_8 {dimension_numbers = #tpu.dot_dimension_numbers<[1], [0], [0], [1], [0, 0, 1, 1], [], []>} : vector<8x512xbf16>, vector<512x128xbf16>, vector<8x128xf32> -> vector<8x128xf32>
    %c0_9 = arith.constant 0 : index
    %c0_10 = arith.constant 0 : index
    %12 = vector.load %arg5[%c0_9, %c0_10] : memref<1x128xf32, #tpu.memory_space<vmem>>, vector<1x128xf32>
    %13 = vector.broadcast %12 : vector<1x128xf32> to vector<8x128xf32>
    %14 = arith.addf %11, %13 : vector<8x128xf32>
    %15 = arith.truncf %14 : vector<8x128xf32> to vector<8x128xbf16>
    %c0_11 = arith.constant 0 : index
    %c0_12 = arith.constant 0 : index
    %16 = vector.load %arg6[%c0_11, %c0_12] : memref<8x128xbf16, #tpu.memory_space<vmem>>, vector<8x128xbf16>
    tpu.vector_store %arg6[%c0_11, %c0_12], %15 {strides = array<i32>} : memref<8x128xbf16, #tpu.memory_space<vmem>>, vector<8x128xbf16>,
    return
  }
  func.func @transform_0(%arg0: i32) -> (i32, i32) {
    %c0_i32 = arith.constant 0 : i32
    %c0_i32_0 = arith.constant 0 : i32
    return %arg0, %c0_i32 : i32, i32
  }
  func.func @transform_1(%arg0: i32) -> (i32, i32) {
    %c0_i32 = arith.constant 0 : i32
    %c0_i32_0 = arith.constant 0 : i32
    %c0_i32_1 = arith.constant 0 : i32
    return %c0_i32, %c0_i32_0 : i32, i32
  }
  func.func @transform_2(%arg0: i32) -> (i32, i32) {
    %c0_i32 = arith.constant 0 : i32
    %c0_i32_0 = arith.constant 0 : i32
    %c0_i32_1 = arith.constant 0 : i32
    return %c0_i32, %c0_i32_0 : i32, i32
  }
  func.func @transform_3(%arg0: i32) -> (i32, i32) {
    %c0_i32 = arith.constant 0 : i32
    %c0_i32_0 = arith.constant 0 : i32
    %c0_i32_1 = arith.constant 0 : i32
    return %c0_i32, %c0_i32_0 : i32, i32
  }
  func.func @transform_4(%arg0: i32) -> (i32, i32) {
    %c0_i32 = arith.constant 0 : i32
    %c0_i32_0 = arith.constant 0 : i32
    %c0_i32_1 = arith.constant 0 : i32
    return %c0_i32, %c0_i32_0 : i32, i32
  }
  func.func @transform_5(%arg0: i32) -> (i32, i32) {
    %c0_i32 = arith.constant 0 : i32
    %c0_i32_0 = arith.constant 0 : i32
    return %arg0, %c0_i32 : i32, i32
  }
}

</mosaic_0001>

<bundles_post_ra>
// kernel: classify_city_forward.1
= control target key start
LH: loop header
LB: loop body
LE: loop exit
PB: predicated region body
PF: predicated region fallthrough
CT: control target
= control target key end

     0   :  { %10 = vsyncpa [#allocation3], 0  ;;  %s1067_s0 = inlined_call_operand.hbm [shape: f32[8,128], index: 0, kind: input, shape index: {}]   ;;  %s1068_s1 = inlined_call_operand.hbm [shape: bf16[128,512], index: 1, kind: input, shape index: {}]   ;;  %s1069_s2 = inlined_call_operand.vmem [shape: f32[1,512], index: 2, kind: input, shape index: {}]   ;;  %s1070_s3 = inlined_call_operand.hbm [shape: bf16[512,128], index: 3, kind: input, shape index: {}]   ;;  %s1071_s4 = inlined_call_operand.vmem [shape: f32[1,128], index: 4, kind: input, shape index: {}]   ;;  %s1072_s5 = inlined_call_operand.vmem [shape: bf16[8,128], index: 5, kind: output, shape index: {}]  }
   0x1   :  { %11 = vsyncpa [#allocation5], 0  ;;  %s984_s18 = smov [#allocation4]   ;;  %s914_s22 = scalar_lea.hbm %s1068_s1, 4096 }
   0x2   :  { %s27_s19 = sshll.u32 %s984_s18, 4  ;;  %p915_p0 = scmp.ne.s32.totalorder %s1068_s1, %s914_s22  ;;  %s28_s19 = int_to_ptr.vmem [resolvable:$true] %s27_s19 }
   0x3   :  { %p918_p1 = scmp.lt.u32.totalorder %s914_s22, %s1068_s1 }
   0x5   :  { %p920_p2 = pnand %p918_p1, %p915_p0 }
   0x7   :  { %923 = shalt.err (!%p920_p2)
}
   0x8   :  { %s924_s27 = scalar_lea.vmem %s28_s19, 4096  ;;  %p929_p4 = scmp.lt.s32.totalorder %s28_s19, %s28_s19 }
   0x9   :  { %p925_p3 = scmp.ne.s32.totalorder %s28_s19, %s924_s27  ;;  %p930_p5 = scmp.lt.s32.totalorder %s924_s27, %s924_s27 }
   0xb   :  { %p931_p6 = por %p930_p5, %p929_p4 }
   0xd   :  { %p932_p7 = pnand %p931_p6, %p925_p3 }
   0xf   :  { %935 = shalt.err (!%p932_p7)
}
  0x10   :  { %s985_s28 = smov 256   ;;  %s986_s29 = smov 16  }
  0x11   :  { %33 = dma.hbm_to_vmem [thread:$0]  %s1068_s1, 4096, %s28_s19, [#allocation5], %s985_s28, %s985_s28, %s986_s29  }
  0x12   :  { %s987_s7 = smov [#allocation2]   ;;  %s988_s9 = smov [#allocation6]  }
  0x13   :  { %s18_s8 = sshll.u32 %s987_s7, 4  ;;  %s41_s10 = sshll.u32 %s988_s9, 4  ;;  %s19_s8 = int_to_ptr.vmem [resolvable:$true] %s18_s8  ;;  %s42_s10 = int_to_ptr.vmem [resolvable:$true] %s41_s10 }
  0x14   :  { %s936_s13 = scalar_lea.hbm %s1067_s0, 128 }
  0x15   :  { %p937_p8 = scmp.ne.s32.totalorder %s1067_s0, %s936_s13  ;;  %p940_p9 = scmp.lt.u32.totalorder %s936_s13, %s1067_s0 }
  0x17   :  { %p942_p10 = pnand %p940_p9, %p937_p8 }
  0x19   :  { %945 = shalt.err (!%p942_p10)
}
  0x1a   :  { %s946_s1 = scalar_lea.vmem %s19_s8, 128  ;;  %p951_p12 = scmp.lt.s32.totalorder %s19_s8, %s19_s8 }
  0x1b   :  { %p947_p11 = scmp.ne.s32.totalorder %s19_s8, %s946_s1  ;;  %p952_p13 = scmp.lt.s32.totalorder %s946_s1, %s946_s1 }
  0x1d   :  { %p953_p0 = por %p952_p13, %p951_p12 }
  0x1f   :  { %p954_p1 = pnand %p953_p0, %p947_p11 }
  0x21   :  { %957 = shalt.err (!%p954_p1)
}
  0x22   :  { %21 = dma.hbm_to_vmem [thread:$0]  %s1067_s0, 128, %s19_s8, [#allocation3]  }
  0x23   :  { %s958_s22 = scalar_lea.hbm %s1070_s3, 4096 }
  0x24   :  { %p959_p2 = scmp.ne.s32.totalorder %s1070_s3, %s958_s22  ;;  %p962_p3 = scmp.lt.u32.totalorder %s958_s22, %s1070_s3 }
  0x26   :  { %p964_p4 = pnand %p962_p3, %p959_p2 }
  0x28   :  { %967 = shalt.err (!%p964_p4)
}
  0x29   :  { %s968_s27 = scalar_lea.vmem %s42_s10, 4096  ;;  %p973_p6 = scmp.lt.s32.totalorder %s42_s10, %s42_s10 }
  0x2a   :  { %p969_p5 = scmp.ne.s32.totalorder %s42_s10, %s968_s27  ;;  %p974_p7 = scmp.lt.s32.totalorder %s968_s27, %s968_s27 }
  0x2c   :  { %p975_p8 = por %p974_p7, %p973_p6 }
  0x2e   :  { %p976_p9 = pnand %p975_p8, %p969_p5 }
  0x30   :  { %979 = shalt.err (!%p976_p9)
}
  0x31   :  { %s989_s0 = smov 64   ;;  %s990_s28 = smov 4  }
  0x32   :  { %47 = dma.hbm_to_vmem [thread:$0]  %s1070_s3, 4096, %s42_s10, [#allocation5], %s989_s0, %s989_s0, %s990_s28  }
  0x33   :  { %980 = dma.done.wait [#allocation3], 128  }
  0x34   :  { %981 = vsyncadd [#allocation3], 4294967168 }
  0x35   :  { %982 = dma.done.wait [#allocation5], 8192  }
  0x36   :  { %983 = vsyncadd [#allocation5], 4294959104  ;;  %v991_v0 = vmov 0   ;;  %v834_v1 = vld [vmem:[#allocation4 + $0x4] ss:$16 sps:$4 sm:$0xff]   ;;  %v60_v33 = vld [vmem:[#allocation2] sm:$0xff] }
  0x37   :  { %308 = vmatprep.mubr.bf16.mxu0 %v991_v0  ;;  %349 = vmatprep.mubr.bf16.mxu1 %v991_v0  ;;  %v836_v2 = vld [vmem:[#allocation4 + $0xc] ss:$16 sps:$4 sm:$0xff]   ;;  %v838_v3 = vld [vmem:[#allocation4] ss:$16 sps:$4 sm:$0xff]   ;;  %v839_v4 = vld [vmem:[#allocation4 + $0x8] ss:$16 sps:$4 sm:$0xff]   ;;  %v61_v37 = vpack.c.bf16 %v60_v33, %v60_v33 }
  0x38   :  { %276 = vmatprep.subr.bf16.mxu0 %v834_v1  ;;  %317 = vmatprep.subr.bf16.mxu1 %v836_v2  ;;  %v840_v5 = vld [vmem:[#allocation4 + $0x24] ss:$16 sps:$4 sm:$0xff]   ;;  %v842_v6 = vld [vmem:[#allocation4 + $0x2c] ss:$16 sps:$4 sm:$0xff]   ;;  %v844_v7 = vld [vmem:[#allocation4 + $0x20] ss:$16 sps:$4 sm:$0xff]  }
  0x39   :  { %277 = vmatpush1.bf16.msra.mxu0 %v838_v3  ;;  %318 = vmatpush1.bf16.msra.mxu1 %v839_v4  ;;  %v845_v8 = vld [vmem:[#allocation4 + $0x28] ss:$16 sps:$4 sm:$0xff]   ;;  %v846_v9 = vld [vmem:[#allocation4 + $0x44] ss:$16 sps:$4 sm:$0xff]   ;;  %v848_v10 = vld [vmem:[#allocation4 + $0x4c] ss:$16 sps:$4 sm:$0xff]   ;;  %v96_v3 = vlaneseq }
  0x3a   :  { %278 = vmatprep.subr.bf16.mxu0 %v840_v5  ;;  %319 = vmatprep.subr.bf16.mxu1 %v842_v6  ;;  %v850_v11 = vld [vmem:[#allocation4 + $0x40] ss:$16 sps:$4 sm:$0xff]   ;;  %v851_v12 = vld [vmem:[#allocation4 + $0x48] ss:$16 sps:$4 sm:$0xff]   ;;  %v852_v13 = vld [vmem:[#allocation4 + $0x64] ss:$16 sps:$4 sm:$0xff]  }
  0x3b   :  { %v854_v14 = vld [vmem:[#allocation4 + $0x6c] ss:$16 sps:$4 sm:$0xff]   ;;  %v856_v15 = vld [vmem:[#allocation4 + $0x60] ss:$16 sps:$4 sm:$0xff]   ;;  %v857_v16 = vld [vmem:[#allocation4 + $0x68] ss:$16 sps:$4 sm:$0xff]  }
  0x3c   :  { %v858_v17 = vld [vmem:[#allocation4 + $0x84] ss:$16 sps:$4 sm:$0xff]   ;;  %v860_v18 = vld [vmem:[#allocation4 + $0x8c] ss:$16 sps:$4 sm:$0xff]   ;;  %v862_v19 = vld [vmem:[#allocation4 + $0x80] ss:$16 sps:$4 sm:$0xff]  }
  0x3d   :  { %279 = vmatpush1.bf16.msra.mxu0 %v844_v7  ;;  %320 = vmatpush1.bf16.msra.mxu1 %v845_v8  ;;  %v863_v20 = vld [vmem:[#allocation4 + $0x88] ss:$16 sps:$4 sm:$0xff]   ;;  %v864_v21 = vld [vmem:[#allocation4 + $0xa4] ss:$16 sps:$4 sm:$0xff]   ;;  %v866_v22 = vld [vmem:[#allocation4 + $0xac] ss:$16 sps:$4 sm:$0xff]  }
  0x3e   :  { %280 = vmatprep.subr.bf16.mxu0 %v846_v9  ;;  %321 = vmatprep.subr.bf16.mxu1 %v848_v10  ;;  %v868_v23 = vld [vmem:[#allocation4 + $0xa0] ss:$16 sps:$4 sm:$0xff]   ;;  %v869_v24 = vld [vmem:[#allocation4 + $0xa8] ss:$16 sps:$4 sm:$0xff]   ;;  %v870_v25 = vld [vmem:[#allocation4 + $0xc4] ss:$16 sps:$4 sm:$0xff]  }
  0x3f   :  { %v872_v26 = vld [vmem:[#allocation4 + $0xcc] ss:$16 sps:$4 sm:$0xff]   ;;  %v874_v27 = vld [vmem:[#allocation4 + $0xc0] ss:$16 sps:$4 sm:$0xff]   ;;  %v875_v28 = vld [vmem:[#allocation4 + $0xc8] ss:$16 sps:$4 sm:$0xff]  }
  0x40   :  { %v876_v29 = vld [vmem:[#allocation4 + $0xe4] ss:$16 sps:$4 sm:$0xff]   ;;  %v878_v30 = vld [vmem:[#allocation4 + $0xec] ss:$16 sps:$4 sm:$0xff]   ;;  %v880_v31 = vld [vmem:[#allocation4 + $0xe0] ss:$16 sps:$4 sm:$0xff]  }
  0x41   :  { %281 = vmatpush1.bf16.msra.mxu0 %v850_v11  ;;  %322 = vmatpush1.bf16.msra.mxu1 %v851_v12  ;;  %v881_v32 = vld [vmem:[#allocation4 + $0xe8] ss:$16 sps:$4 sm:$0xff]   ;;  %v882_v34 = vld [vmem:[#allocation6 + $0x40] sm:$0xff]   ;;  %v890_v43 = vld [vmem:[#allocation6 + $0x50] sm:$0xff]   ;;  %v97_v4 = vshrl.u32 %v96_v3, 7 }
  0x42   :  { %282 = vmatprep.subr.bf16.mxu0 %v852_v13  ;;  %323 = vmatprep.subr.bf16.mxu1 %v854_v14  ;;  %v883_v35 = vld [vmem:[#allocation6 + $0xc0] sm:$0xff]   ;;  %v886_v39 = vld [vmem:[#allocation6 + $0x48] sm:$0xff]   ;;  %v891_v44 = vld [vmem:[#allocation6 + $0xd0] sm:$0xff]  }
  0x43   :  { %v884_v36 = vld [vmem:[#allocation6] sm:$0xff]   ;;  %v887_v40 = vld [vmem:[#allocation6 + $0xc8] sm:$0xff]   ;;  %v892_v45 = vld [vmem:[#allocation6 + $0x10] sm:$0xff]   ;;  %v98_v5 = vsub.s32 0, %v97_v4  ;;  %v106_v6 = vsub.s32 2, %v97_v4  ;;  %v102_v8 = vsub.s32 1, %v97_v4 }
  0x44   :  { %v885_v38 = vld [vmem:[#allocation6 + $0x80] sm:$0xff]   ;;  %v888_v41 = vld [vmem:[#allocation6 + $0x8] sm:$0xff]   ;;  %v893_v46 = vld [vmem:[#allocation6 + $0x90] sm:$0xff]   ;;  %v110_v9 = vsub.s32 3, %v97_v4 }
  0x45   :  { %283 = vmatpush1.bf16.msra.mxu0 %v856_v15  ;;  %324 = vmatpush1.bf16.msra.mxu1 %v857_v16  ;;  %v889_v42 = vld [vmem:[#allocation6 + $0x88] sm:$0xff]   ;;  %v894_v47 = vld [vmem:[#allocation6 + $0x58] sm:$0xff]   ;;  %v898_v51 = vld [vmem:[#allocation6 + $0x60] sm:$0xff]  }
  0x46   :  { %284 = vmatprep.subr.bf16.mxu0 %v858_v17  ;;  %325 = vmatprep.subr.bf16.mxu1 %v860_v18  ;;  %v895_v48 = vld [vmem:[#allocation6 + $0xd8] sm:$0xff]   ;;  %v899_v52 = vld [vmem:[#allocation6 + $0xe0] sm:$0xff]   ;;  %v902_v55 = vld [vmem:[#allocation6 + $0x68] sm:$0xff]  }
  0x47   :  { %v896_v49 = vld [vmem:[#allocation6 + $0x18] sm:$0xff]   ;;  %v900_v53 = vld [vmem:[#allocation6 + $0x20] sm:$0xff]   ;;  %v903_v56 = vld [vmem:[#allocation6 + $0xe8] sm:$0xff]  }
  0x48   :  { %v897_v50 = vld [vmem:[#allocation6 + $0x98] sm:$0xff]   ;;  %v901_v54 = vld [vmem:[#allocation6 + $0xa0] sm:$0xff]   ;;  %v904_v57 = vld [vmem:[#allocation6 + $0x28] sm:$0xff]  }
  0x49   :  { %285 = vmatpush1.bf16.msra.mxu0 %v862_v19  ;;  %326 = vmatpush1.bf16.msra.mxu1 %v863_v20  ;;  %v905_v58 = vld [vmem:[#allocation6 + $0xa8] sm:$0xff]   ;;  %v906_v59 = vld [vmem:[#allocation6 + $0x70] sm:$0xff]   ;;  %v910_v63 = vld [vmem:[#allocation6 + $0x78] sm:$0xff]  }
  0x4a   :  { %286 = vmatprep.subr.bf16.mxu0 %v864_v21  ;;  %327 = vmatprep.subr.bf16.mxu1 %v866_v22  ;;  %v907_v60 = vld [vmem:[#allocation6 + $0xf0] sm:$0xff]   ;;  %v911_v0 = vld [vmem:[#allocation6 + $0xf8] sm:$0xff]  }
  0x4b   :  { %v908_v61 = vld [vmem:[#allocation6 + $0x30] sm:$0xff]   ;;  %v912_v1 = vld [vmem:[#allocation6 + $0x38] sm:$0xff]  }
  0x4c   :  { %v909_v62 = vld [vmem:[#allocation6 + $0xb0] sm:$0xff]   ;;  %v913_v2 = vld [vmem:[#allocation6 + $0xb8] sm:$0xff]  }
  0x4d   :  { %287 = vmatpush1.bf16.msra.mxu0 %v868_v23  ;;  %328 = vmatpush1.bf16.msra.mxu1 %v869_v24  ;;  %v94_v7 = vld [vmem:[%s1069_s2] sm:$0xf] }
  0x4e   :  { %288 = vmatprep.subr.bf16.mxu0 %v870_v25  ;;  %329 = vmatprep.subr.bf16.mxu1 %v872_v26  ;;  %v99_v10 = vrot.slane %v94_v7, %v98_v5  ;;  %v107_v11 = vrot.slane %v94_v7, %v106_v6  ;;  %v103_v12 = vrot.slane %v94_v7, %v102_v8 }
  0x4f   :  { %v111_v13 = vrot.slane %v94_v7, %v110_v9 }
  0x51   :  { %289 = vmatpush1.bf16.msra.mxu0 %v874_v27  ;;  %330 = vmatpush1.bf16.msra.mxu1 %v875_v28 }
  0x52   :  { %290 = vmatprep.subr.bf16.mxu0 %v876_v29  ;;  %331 = vmatprep.subr.bf16.mxu1 %v878_v30 }
  0x55   :  { %291 = vmatpush1.bf16.msra.mxu0 %v880_v31  ;;  %332 = vmatpush1.bf16.msra.mxu1 %v881_v32 }
  0x56   :  { %782 = vmatprep.subr.bf16.mxu0 %v882_v34  ;;  %804 = vmatprep.subr.bf16.mxu1 %v883_v35 }
  0x58   :  { %309 = vmatmul.mubr.bf16.vlgmr.msra.gmra.mrb[0].mxu0 %v61_v37  ;;  %350 = vmatmul.mubr.bf16.vlgmr.msra.gmra.mrb[0].mxu1 %v61_v37 }
  0x59   :  { %783 = vmatpush3.bf16.msra.mxu0 %v884_v36  ;;  %805 = vmatpush3.bf16.msra.mxu1 %v885_v38  ;;  %v749_v36 = vld [vmem:[%s1071_s4] ss:$0 sm:$0xff] }
  0x5a   :  { %784 = vmatprep.subr.bf16.mxu0 %v886_v39  ;;  %806 = vmatprep.subr.bf16.mxu1 %v887_v40 }
  0x5d   :  { %785 = vmatpush3.bf16.msra.mxu0 %v888_v41  ;;  %807 = vmatpush3.bf16.msra.mxu1 %v889_v42 }
  0x5e   :  { %786 = vmatprep.subr.bf16.mxu0 %v890_v43  ;;  %808 = vmatprep.subr.bf16.mxu1 %v891_v44 }
  0x61   :  { %787 = vmatpush3.bf16.msra.mxu0 %v892_v45  ;;  %809 = vmatpush3.bf16.msra.mxu1 %v893_v46 }
  0x62   :  { %788 = vmatprep.subr.bf16.mxu0 %v894_v47  ;;  %810 = vmatprep.subr.bf16.mxu1 %v895_v48 }
  0x65   :  { %789 = vmatpush3.bf16.msra.mxu0 %v896_v49  ;;  %811 = vmatpush3.bf16.msra.mxu1 %v897_v50 }
  0x66   :  { %790 = vmatprep.subr.bf16.mxu0 %v898_v51  ;;  %812 = vmatprep.subr.bf16.mxu1 %v899_v52 }
  0x69   :  { %791 = vmatpush3.bf16.msra.mxu0 %v900_v53  ;;  %813 = vmatpush3.bf16.msra.mxu1 %v901_v54 }
  0x6a   :  { %792 = vmatprep.subr.bf16.mxu0 %v902_v55  ;;  %814 = vmatprep.subr.bf16.mxu1 %v903_v56 }
  0x6d   :  { %793 = vmatpush3.bf16.msra.mxu0 %v904_v57  ;;  %815 = vmatpush3.bf16.msra.mxu1 %v905_v58 }
  0x6e   :  { %794 = vmatprep.subr.bf16.mxu0 %v906_v59  ;;  %816 = vmatprep.subr.bf16.mxu1 %v907_v60 }
  0x71   :  { %795 = vmatpush3.bf16.msra.mxu0 %v908_v61  ;;  %817 = vmatpush3.bf16.msra.mxu1 %v909_v62 }
  0x72   :  { %796 = vmatprep.subr.bf16.mxu0 %v910_v63  ;;  %818 = vmatprep.subr.bf16.mxu1 %v911_v0 }
  0x75   :  { %797 = vmatpush3.bf16.msra.mxu0 %v912_v1  ;;  %819 = vmatpush3.bf16.msra.mxu1 %v913_v2 }
 0x12b   :  { %v310_v14 = vpop.f32.mrb[0].mxu0  ;;  %v351_v15 = vpop.f32.mrb[0].mxu1 }
 0x12c   :  { %v311_v16 = vadd.f32 %v310_v14, %v99_v10  ;;  %v352_v17 = vadd.f32 %v351_v15, %v107_v11  ;;  %v312_v18 = vpop.f32.mrb[1].mxu0  ;;  %v353_v19 = vpop.f32.mrb[1].mxu1 }
 0x12d   :  { %v313_v20 = vadd.f32 %v312_v18, %v103_v12  ;;  %v354_v21 = vadd.f32 %v353_v19, %v111_v13  ;;  %v314_v22 = vpop.f32.mrb[2].mxu0  ;;  %v355_v23 = vpop.f32.mrb[2].mxu1 }
 0x12e   :  { %v358_v24 = vmax.f32 %v311_v16, 0.0  ;;  %v360_v25 = vmax.f32 %v352_v17, 0.0  ;;  %v315_v26 = vpop.f32.mrb[3].mxu0  ;;  %v356_v27 = vpop.f32.mrb[3].mxu1 }
 0x12f   :  { %v359_v28 = vmax.f32 %v313_v20, 0.0  ;;  %v361_v29 = vmax.f32 %v354_v21, 0.0 }
 0x130   :  { %v364_v30 = vpack.c.bf16 %v360_v25, %v360_v25  ;;  %v362_v33 = vpack.c.bf16 %v358_v24, %v358_v24 }
 0x131   :  { %v363_v31 = vpack.c.bf16 %v359_v28, %v359_v28  ;;  %v365_v32 = vpack.c.bf16 %v361_v29, %v361_v29 }
 0x133   :  { %661 = vmatprep.mubr.bf16.mxu0 %v363_v31  ;;  %701 = vmatprep.mubr.bf16.mxu1 %v365_v32 }
 0x134   :  { %662 = vmatmul.mubr.bf16.vlgmr.msra.gmra.mrb[4].mxu0 %v362_v33  ;;  %702 = vmatmul.mubr.bf16.vlgmr.msra.gmra.mrb[4].mxu1 %v364_v30 }
 0x207   :  { %v798_v34 = vpop.f32.mrb[4].mxu0  ;;  %v820_v35 = vpop.f32.mrb[4].mxu1 }
 0x208   :  { %v799_v37 = vpop.f32.mrb[5].mxu0  ;;  %v821_v38 = vpop.f32.mrb[5].mxu1 }
 0x209   :  { %v800_v39 = vadd.f32 %v799_v37, %v798_v34  ;;  %v822_v40 = vadd.f32 %v821_v38, %v820_v35  ;;  %v801_v41 = vpop.f32.mrb[6].mxu0  ;;  %v823_v42 = vpop.f32.mrb[6].mxu1 }
 0x20a   :  { %v802_v43 = vpop.f32.mrb[7].mxu0  ;;  %v824_v44 = vpop.f32.mrb[7].mxu1 }
 0x20b   :  { %v664_v45 = vadd.f32 %v800_v39, %v749_v36 }
 0x20d   :  { %v704_v46 = vadd.f32 %v822_v40, %v664_v45 }
 0x20f   :  { %v709_v47 = vpack.c.bf16 %v704_v46, %v704_v46 }
 0x211   :  { %710 = vst [vmem:[%s1072_s5] sm:$0xf] %v709_v47 }
 0x212   :  { %715 = vsyncpa [#allocation3], 1 }
 0x213   :  { %716 = vsyncpa [#allocation5], 1 }

</bundles_post_ra>
